<compile_context>
chip_gen: v7x
topology: tpu7x:2x2x1
jax: 0.10.0
libtpu: 0.0.40
codegen_flags: <defaults>
</compile_context>

<pallas_src>
import jax
import jax.numpy as jnp
import numpy as np
from jax.experimental import pallas as pl
from jax.experimental.pallas import tpu as pltpu

_LANE_CANDIDATES = (1024, 896, 768, 640, 512, 384, 256, 128)
_TARGET_BLOCK_ELEMS = 1 << 20      # ~1M elements -> 4 MiB f32 per input tile
_VMEM_LIMIT_BYTES = 40 << 20       # explicit: v5e scoped default is only 16 MiB


def _round_up(a, b):
    return ((a + b - 1) // b) * b


def _make_kernel(x_min, width, bins):
    x_min = np.float32(x_min)
    width = np.float32(width)
    bins_f = np.float32(bins)
    max_idx = np.int32(bins - 1)

    def kernel(x_ref, o_ref):
        x = x_ref[...]
        # Exact reference arithmetic order (matches torch forward, including
        # rounding at bin boundaries): sub -> div -> mul -> trunc cast -> clamp.
        x_norm = (x - x_min) / width
        idx = (x_norm * bins_f).astype(jnp.int32)   # truncates toward zero
        o_ref[...] = jnp.minimum(idx, max_idx).astype(o_ref.dtype)

    return kernel


def _choose_block_rows(rows, lanes):
    if rows <= 8:
        return rows                     # single full-extent block (tiny input)
    # Both candidates are multiples of 8 so the (8, 128) tiling constraint
    # holds even when the last grid block is partial.
    by_vmem = max(8, (_TARGET_BLOCK_ELEMS // lanes) // 8 * 8)
    by_split = _round_up(pl.cdiv(rows, 2), 8)   # >= 2 blocks -> both v7x TCs busy
    return min(by_vmem, by_split)


def _run_2d(x2d, kernel, out_dtype):
    rows, lanes = x2d.shape
    block_rows = _choose_block_rows(rows, lanes)
    grid = (pl.cdiv(rows, block_rows),)
    n = rows * lanes
    out_bytes = np.dtype(out_dtype).itemsize
    return pl.pallas_call(
        kernel,
        out_shape=jax.ShapeDtypeStruct((rows, lanes), out_dtype),
        grid=grid,
        in_specs=[pl.BlockSpec((block_rows, lanes), lambda i: (i, 0))],
        out_specs=pl.BlockSpec((block_rows, lanes), lambda i: (i, 0)),
        compiler_params=pltpu.CompilerParams(
            dimension_semantics=("parallel",),
            vmem_limit_bytes=_VMEM_LIMIT_BYTES,
        ),
        cost_estimate=pl.CostEstimate(
            flops=4 * n,
            transcendentals=0,
            bytes_accessed=(x2d.dtype.itemsize + out_bytes) * n,
        ),
    )(x2d)


def _run_tail(tail2d, kernel, out_dtype):
    # <1024 leftover elements: single full-extent block, no grid.
    return pl.pallas_call(
        kernel,
        out_shape=jax.ShapeDtypeStruct(tail2d.shape, out_dtype),
        compiler_params=pltpu.CompilerParams(
            vmem_limit_bytes=_VMEM_LIMIT_BYTES),
    )(tail2d)


@jax.jit
def _minmax(a):
    return jnp.stack([jnp.min(a), jnp.max(a)])


def uniform_binner_forward(x, *, value_range, bins, out_dtype=jnp.int32,
                           validate=False):
    """Pallas implementation of UniformBinner.forward.

    Args:
      x: float array of any shape, values expected inside `value_range`.
      value_range: (x_min, x_max) python floats.
      bins: python int, number of uniform bins.
      out_dtype: dtype of the returned bin indices (int32 default; int8/int16
        allowed for a bandwidth win when bins is small).
      validate: if True, performs the module's (blocking) range check with a
        single fused reduction and one device->host transfer.
    Returns:
      `out_dtype` array of the same shape as x with bin indices in [0, bins-1].
    """
    x_min, x_max = float(value_range[0]), float(value_range[1])
    bins = int(bins)
    # Width computed in f32 to match the torch f32 buffer arithmetic.
    width = float(np.float32(x_max) - np.float32(x_min))

    if validate:
        lo, hi = np.asarray(_minmax(x))
        if lo < x_min or hi > x_max:
            raise ValueError("input out of range")

    kernel = _make_kernel(x_min, width, bins)

    orig_shape = x.shape
    n = x.size
    if n == 0:
        return jnp.zeros(orig_shape, dtype=out_dtype)

    # Fast path: element count divisible by a multiple of 128 -> zero-copy
    # reshape to a lane-dense slab, single pallas_call, no padding/slicing.
    lanes = next((c for c in _LANE_CANDIDATES if n % c == 0), None)
    if lanes is not None:
        out2d = _run_2d(x.reshape(n // lanes, lanes), kernel, out_dtype)
        return out2d.reshape(orig_shape)

    # Rare path (n % 128 != 0): 1024-aligned bulk + tiny tail, one concat.
    flat = x.reshape(n)
    bulk = (n // _LANE_CANDIDATES[0]) * _LANE_CANDIDATES[0]
    pieces = []
    if bulk:
        bulk2d = flat[:bulk].reshape(bulk // _LANE_CANDIDATES[0],
                                     _LANE_CANDIDATES[0])
        pieces.append(_run_2d(bulk2d, kernel, out_dtype).reshape(bulk))
    tail = n - bulk
    if tail:
        tail2d = flat[bulk:].reshape(1, tail)
        pieces.append(_run_tail(tail2d, kernel, out_dtype).reshape(tail))
    out_flat = pieces[0] if len(pieces) == 1 else jnp.concatenate(pieces)
    return out_flat.reshape(orig_shape)


if __name__ == "__main__":
    # Deterministic "buffers" matching the module's __init__.
    value_range = (0.0, 1.0)
    bins = 16

    key = jax.random.PRNGKey(0)
    x = jax.random.uniform(
        key, (2, 4, 16, 16), dtype=jnp.float32,
        minval=value_range[0], maxval=value_range[1],
    )

    out = uniform_binner_forward(x, value_range=value_range, bins=bins)
    out = jax.block_until_ready(out)

    # Reference check in plain JAX (same arithmetic order as torch forward).
    x_min32, x_max32 = np.float32(value_range[0]), np.float32(value_range[1])
    ref = jnp.minimum(
        (((x - x_min32) / (x_max32 - x_min32)) * np.float32(bins)).astype(jnp.int32),
        bins - 1,
    )
    assert out.shape == x.shape
    assert out.dtype == jnp.int32
    assert bool(jnp.all(out == ref))
    assert int(jnp.min(out)) >= 0 and int(jnp.max(out)) <= bins - 1

    # Also exercise the non-128-divisible (bulk + tail) path.
    x2 = jax.random.uniform(jax.random.PRNGKey(1), (3, 1000), dtype=jnp.float32)
    out2 = jax.block_until_ready(
        uniform_binner_forward(x2, value_range=value_range, bins=bins))
    ref2 = jnp.minimum(
        (((x2 - x_min32) / (x_max32 - x_min32)) * np.float32(bins)).astype(jnp.int32),
        bins - 1,
    )
    assert out2.shape == x2.shape
    assert bool(jnp.all(out2 == ref2))

    print("KERNEL_OK")
</pallas_src>

<mosaic_0001>
module attributes {stable_mosaic.version = 11 : i64} {
  func.func @kernel(%arg0: i32, %arg1: memref<2x1024xf32, #tpu.memory_space<vmem>>, %arg2: memref<2x1024xi32, #tpu.memory_space<vmem>>) attributes {dimension_semantics = [#tpu.dimension_semantics<parallel>], iteration_bounds = array<i64: 1>, scalar_prefetch = 0 : i64, scratch_operands = 0 : i64, tpu.core_type = #tpu.core_type<tc>, window_params = [{transform_indices = @transform_0, window_bounds = array<i64: 2, 1024>}, {transform_indices = @transform_1, window_bounds = array<i64: 2, 1024>}]} {
    %c0 = arith.constant 0 : index
    %c0_0 = arith.constant 0 : index
    %0 = vector.load %arg1[%c0, %c0_0] : memref<2x1024xf32, #tpu.memory_space<vmem>>, vector<2x1024xf32>
    %cst = arith.constant 0.000000e+00 : f32
    %1 = vector.broadcast %cst : f32 to vector<2x1024xf32>
    %2 = arith.subf %0, %1 : vector<2x1024xf32>
    %cst_1 = arith.constant 1.000000e+00 : f32
    %3 = vector.broadcast %cst_1 : f32 to vector<2x1024xf32>
    %4 = arith.divf %2, %3 : vector<2x1024xf32>
    %cst_2 = arith.constant 1.600000e+01 : f32
    %5 = vector.broadcast %cst_2 : f32 to vector<2x1024xf32>
    %6 = arith.mulf %4, %5 : vector<2x1024xf32>
    %7 = arith.fptosi %6 : vector<2x1024xf32> to vector<2x1024xi32>
    %c15_i32 = arith.constant 15 : i32
    %8 = vector.broadcast %c15_i32 : i32 to vector<2x1024xi32>
    %9 = arith.minsi %7, %8 : vector<2x1024xi32>
    %c0_3 = arith.constant 0 : index
    %c0_4 = arith.constant 0 : index
    %10 = vector.load %arg2[%c0_3, %c0_4] : memref<2x1024xi32, #tpu.memory_space<vmem>>, vector<2x1024xi32>
    tpu.vector_store %arg2[%c0_3, %c0_4], %9 {strides = array<i32>} : memref<2x1024xi32, #tpu.memory_space<vmem>>, vector<2x1024xi32>,
    return
  }
  func.func @transform_0(%arg0: i32) -> (i32, i32) {
    %c0_i32 = arith.constant 0 : i32
    %c0_i32_0 = arith.constant 0 : i32
    return %arg0, %c0_i32 : i32, i32
  }
  func.func @transform_1(%arg0: i32) -> (i32, i32) {
    %c0_i32 = arith.constant 0 : i32
    %c0_i32_0 = arith.constant 0 : i32
    return %arg0, %c0_i32 : i32, i32
  }
}

</mosaic_0001>

<bundles_post_ra>
// kernel: tpu_custom_call.1
= control target key start
LH: loop header
LB: loop body
LE: loop exit
PB: predicated region body
PF: predicated region fallthrough
CT: control target
= control target key end

     0   :  { %6 = vsyncpa [#allocation3], 0  ;;  %s138_s0 = inlined_call_operand.hbm [shape: f32[2,1024], index: 0, kind: input, shape index: {}]   ;;  %s139_s1 = inlined_call_operand.hbm [shape: s32[2,1024], index: 1, kind: output, shape index: {}]  }
   0x1   :  { %7 = vsyncpa [#allocation4], 0  ;;  %s102_s6 = smov [#allocation2]   ;;  %s54_s10 = scalar_lea.hbm %s138_s0, 256 }
   0x2   :  { %s14_s7 = sshll.u32 %s102_s6, 4  ;;  %p55_p0 = scmp.ne.s32.totalorder %s138_s0, %s54_s10  ;;  %s15_s7 = int_to_ptr.vmem [resolvable:$true] %s14_s7 }
   0x3   :  { %p58_p1 = scmp.lt.u32.totalorder %s54_s10, %s138_s0 }
   0x5   :  { %p60_p2 = pnand %p58_p1, %p55_p0 }
   0x7   :  { %63 = shalt.err (!%p60_p2)
}
   0x8   :  { %s64_s15 = scalar_lea.vmem %s15_s7, 256  ;;  %p69_p4 = scmp.lt.s32.totalorder %s15_s7, %s15_s7 }
   0x9   :  { %p65_p3 = scmp.ne.s32.totalorder %s15_s7, %s64_s15  ;;  %p70_p5 = scmp.lt.s32.totalorder %s64_s15, %s64_s15 }
   0xb   :  { %p71_p6 = por %p70_p5, %p69_p4 }
   0xd   :  { %p72_p7 = pnand %p71_p6, %p65_p3 }
   0xf   :  { %75 = shalt.err (!%p72_p7)
}
  0x10   :  { %17 = dma.hbm_to_vmem [thread:$0]  %s138_s0, 256, %s15_s7, [#allocation3]  }
  0x11   :  { %98 = dma.done.wait [#allocation3], 256  }
  0x12   :  { %99 = vsyncadd [#allocation3], 4294967040  ;;  %v21_v0 = vld [vmem:[#allocation2] sm:$0xff]  ;;  %v22_v1 = vld [vmem:[#allocation2 + $0x8] sm:$0xff]  ;;  %s103_s18 = smov [#allocation5]  }
  0x13   :  { %v23_v2 = vmul.f32 16.0, %v21_v0  ;;  %v24_v3 = vmul.f32 16.0, %v22_v1  ;;  %s39_s19 = sshll.u32 %s103_s18, 4  ;;  %s40_s19 = int_to_ptr.vmem [resolvable:$true] %s39_s19 }
  0x14   :  { %s76_s0 = scalar_lea.vmem %s40_s19, 256  ;;  %p81_p9 = scmp.lt.s32.totalorder %s40_s19, %s40_s19 }
  0x15   :  { %v48_v4 = vtrunc.f32 %v23_v2  ;;  %v50_v5 = vtrunc.f32 %v24_v3  ;;  %p77_p8 = scmp.ne.s32.totalorder %s40_s19, %s76_s0  ;;  %p82_p10 = scmp.lt.s32.totalorder %s76_s0, %s76_s0 }
  0x17   :  { %v49_v6 = vcvt.f32.s32 %v48_v4  ;;  %v51_v7 = vcvt.f32.s32 %v50_v5  ;;  %p83_p11 = por %p82_p10, %p81_p9 }
  0x19   :  { %vm27_vm0 = vcmp.lt.s32.totalorder %v49_v6, 15  ;;  %vm29_vm1 = vcmp.lt.s32.totalorder %v51_v7, 15  ;;  %p84_p12 = pnand %p83_p11, %p77_p8 }
  0x1a   :  { %v28_v8 = vsel %vm27_vm0, %v49_v6, 15  ;;  %v30_v9 = vsel %vm29_vm1, %v51_v7, 15 }
  0x1b   :  { %31 = vst [vmem:[#allocation5] sm:$0xff] %v28_v8  ;;  %32 = vst [vmem:[#allocation5 + $0x8] sm:$0xff] %v30_v9 }
  0x1c   :  { %87 = shalt.err (!%p84_p12)
}
  0x1d   :  { %s88_s22 = scalar_lea.hbm %s139_s1, 256 }
  0x1e   :  { %p89_p13 = scmp.ne.s32.totalorder %s139_s1, %s88_s22  ;;  %p92_p0 = scmp.lt.u32.totalorder %s88_s22, %s139_s1 }
  0x20   :  { %p94_p1 = pnand %p92_p0, %p89_p13 }
  0x22   :  { %97 = shalt.err (!%p94_p1)
}
  0x23   :  { %42 = dma.vmem_to_hbm [thread:$0]  %s40_s19, 256, %s139_s1, [#allocation4]  }
  0x24   :  { %100 = dma.done.wait [#allocation4], 256  }
  0x25   :  { %101 = vsyncadd [#allocation4], 4294967040 }
  0x26   :  { %46 = vsyncpa [#allocation3], 1 }
  0x27   :  { %47 = vsyncpa [#allocation4], 1 }

</bundles_post_ra>
